<compile_context>
chip_gen: v7x
topology: tpu7x:2x2x1
jax: 0.10.0
libtpu: 0.0.40
codegen_flags: <defaults>
</compile_context>

<pallas_src>
import jax
import jax.numpy as jnp
from jax.experimental import pallas as pl
from jax.experimental.pallas import tpu as pltpu


def _round_up(n: int, m: int) -> int:
    return ((n + m - 1) // m) * m


# --------------------------------------------------------------------------- #
# Kernel
# --------------------------------------------------------------------------- #
def encoder_kernel(x_ref, w1_ref, b1_ref, w2_ref, b2_ref, o_ref):
    # f32 -> bf16 cast in-kernel (VPU), so x needs no padded/cast HBM copy.
    x = x_ref[...].astype(jnp.bfloat16)
    # fc1: bf16 operands -> f32 accumulate on the MXU, bias + ReLU in f32.
    h = jnp.dot(x, w1_ref[...], preferred_element_type=jnp.float32)
    h = jnp.maximum(h + b1_ref[...], 0.0)          # broadcast [1, Hp] over rows
    # fc2: cast activations to bf16 for the second MXU pass, f32 accumulate.
    o = jnp.dot(h.astype(jnp.bfloat16), w2_ref[...],
                preferred_element_type=jnp.float32)
    # Lane-dense (last dim = 128) bf16 store.
    o_ref[...] = (o + b2_ref[...]).astype(o_ref.dtype)


# --------------------------------------------------------------------------- #
# One-time parameter packing (do at init, NOT per forward call)
# --------------------------------------------------------------------------- #
def pack_encoder_params(w1, b1, w2, b2):
    """Pad feature dims to multiples of 128 and cast weights to bf16.

    w1: [D_in, H], b1: [H] or [1, H], w2: [H, L], b2: [L] or [1, L].
    Returns (packed_params, (H, L)).
    Zero pads contribute exactly zero through matmul / ReLU / bias.
    """
    D_in, H = w1.shape
    L = w2.shape[1]
    Hp = _round_up(H, 128)
    Lp = _round_up(L, 128)

    b1 = jnp.asarray(b1, jnp.float32).reshape(1, H)
    b2 = jnp.asarray(b2, jnp.float32).reshape(1, L)

    w1_p = jnp.zeros((D_in, Hp), jnp.bfloat16).at[:, :H].set(w1.astype(jnp.bfloat16))
    b1_p = jnp.zeros((1, Hp), jnp.float32).at[:, :H].set(b1)
    w2_p = jnp.zeros((Hp, Lp), jnp.bfloat16).at[:H, :L].set(w2.astype(jnp.bfloat16))
    b2_p = jnp.zeros((1, Lp), jnp.float32).at[:, :L].set(b2)
    return (w1_p, b1_p, w2_p, b2_p), (H, L)


def _choose_tb(B: int, *, min_steps: int = 2, max_tb: int = 1024) -> int:
    """Large tiles amortize ~0.35us/step pipeline overhead; keep >= min_steps
    (even) grid steps for DMA/compute overlap and 2-TC sharding on v7x, and
    pick tb ~ B/min_steps so Bp/B inflation stays small."""
    tb = _round_up(max(1, -(-B // min_steps)), 8)
    return max(8, min(tb, max_tb))


# --------------------------------------------------------------------------- #
# Forward wrapper
# --------------------------------------------------------------------------- #
def encoder_forward(x, packed_params, *, tb=None):
    """x: [B, D_in] f32; packed_params from pack_encoder_params().

    Returns the PADDED (Bp, Lp) bf16 output; consumers should read the padded
    layout or fuse `[:B, :L]` into their next op.  Padded rows/cols are NOT
    guaranteed zero (pad batch rows contain relu(b1)@w2 + b2).
    """
    w1_p, b1_p, w2_p, b2_p = packed_params
    B, D_in = x.shape
    Hp = w1_p.shape[1]
    Lp = w2_p.shape[1]

    if tb is None:
        tb = _choose_tb(B)
    Bp = _round_up(B, tb)
    if Bp != B:
        # Only the batch axis ever needs padding (feature axis is read as-is).
        x = jnp.pad(x, ((0, Bp - B), (0, 0)))

    grid = (Bp // tb,)

    # VMEM budget (double-buffered) at tb=1024: x 2*128KiB + out 2*256KiB +
    # weights ~80KiB -> well under even v5e's 16 MiB default scoped VMEM.
    out_p = pl.pallas_call(
        encoder_kernel,
        out_shape=jax.ShapeDtypeStruct((Bp, Lp), jnp.bfloat16),
        grid_spec=pltpu.PrefetchScalarGridSpec(
            num_scalar_prefetch=0,
            grid=grid,
            in_specs=[
                # batch-tiled activations, unpadded f32 (last block dim equals
                # the full array dim -> legal; cast to bf16 in-kernel).
                pl.BlockSpec((tb, D_in), lambda i: (i, 0)),
                # weights / biases: constant index_map -> fetched once,
                # VMEM-resident across the whole grid.
                # TODO(synk): if encoder dims ever scale up (v7x has only
                # 64 MiB VMEM), add pipeline_mode=pl.Buffered(1) on these
                # invariant blocks and set vmem_limit_bytes explicitly.
                pl.BlockSpec((D_in, Hp), lambda i: (0, 0)),
                pl.BlockSpec((1, Hp), lambda i: (0, 0)),
                pl.BlockSpec((Hp, Lp), lambda i: (0, 0)),
                pl.BlockSpec((1, Lp), lambda i: (0, 0)),
            ],
            out_specs=pl.BlockSpec((tb, Lp), lambda i: (i, 0)),
        ),
        compiler_params=pltpu.CompilerParams(
            # batch axis is fully independent -> shard across TCs on v7x
            dimension_semantics=("parallel",),
        ),
    )(x, w1_p, b1_p, w2_p, b2_p)

    return out_p


# --------------------------------------------------------------------------- #
# References
# --------------------------------------------------------------------------- #
def reference_forward_f32(x, w1, b1, w2, b2):
    h = jnp.maximum(x @ w1 + b1, 0.0)
    return h @ w2 + b2


def reference_forward_bf16(x, w1, b1, w2, b2):
    # Same numerics as the kernel: bf16 MXU operands, f32 accumulation,
    # bias + ReLU in f32.
    h = jnp.dot(x.astype(jnp.bfloat16), w1.astype(jnp.bfloat16),
                preferred_element_type=jnp.float32) + b1
    h = jnp.maximum(h, 0.0)
    o = jnp.dot(h.astype(jnp.bfloat16), w2.astype(jnp.bfloat16),
                preferred_element_type=jnp.float32) + b2
    return o


if __name__ == "__main__":
    # Shapes consistent with the module; batch large enough that the chosen
    # tile is 512 wide and the grid has 2 steps (DMA/compute overlap, even
    # step count for v7x's 2 TensorCores).
    B, D_IN, HIDDEN, LATENT = 1024, 32, 64, 16

    key = jax.random.PRNGKey(0)
    kx, kw1, kb1, kw2, kb2 = jax.random.split(key, 5)

    x = jax.random.normal(kx, (B, D_IN), dtype=jnp.float32)

    # Deterministic parameter init (PyTorch-Linear-like uniform bounds), stored
    # as [in, out] so the kernel can matmul without transposes.
    bound1 = 1.0 / (D_IN ** 0.5)
    w1 = jax.random.uniform(kw1, (D_IN, HIDDEN), jnp.float32, -bound1, bound1)
    b1 = jax.random.uniform(kb1, (HIDDEN,), jnp.float32, -bound1, bound1)

    bound2 = 1.0 / (HIDDEN ** 0.5)
    w2 = jax.random.uniform(kw2, (HIDDEN, LATENT), jnp.float32, -bound2, bound2)
    b2 = jax.random.uniform(kb2, (LATENT,), jnp.float32, -bound2, bound2)

    # One-time packing (hoisted out of the forward path).
    packed, (H, L) = pack_encoder_params(w1, b1, w2, b2)

    out_padded = encoder_forward(x, packed)
    out_padded = jax.block_until_ready(out_padded)

    # De-pad only for verification (real consumers fuse this or read padded).
    out = out_padded[:B, :L].astype(jnp.float32)
    assert out.shape == (B, LATENT)

    # Tight check against a reference with identical bf16-operand / f32-accum
    # math (kernel output is bf16, hence the ~bf16-rounding tolerance).
    ref_bf16 = reference_forward_bf16(x, w1, b1.reshape(1, -1),
                                      w2, b2.reshape(1, -1))
    assert jnp.allclose(out, ref_bf16, atol=3e-2, rtol=3e-2), \
        "mismatch vs bf16-operand reference"

    # Loose check against the pure-f32 PyTorch-equivalent forward (bf16
    # operand/output rounding is the only difference).
    ref_f32 = reference_forward_f32(x, w1, b1.reshape(1, -1),
                                    w2, b2.reshape(1, -1))
    assert jnp.allclose(out, ref_f32, atol=7e-2, rtol=7e-2), \
        "mismatch vs f32 reference"

    print("KERNEL_OK")
</pallas_src>

<mosaic_0001>
module attributes {stable_mosaic.version = 11 : i64} {
  func.func @encoder_kernel(%arg0: i32, %arg1: memref<512x32xf32, #tpu.memory_space<vmem>>, %arg2: memref<32x128xbf16, #tpu.memory_space<vmem>>, %arg3: memref<1x128xf32, #tpu.memory_space<vmem>>, %arg4: memref<128x128xbf16, #tpu.memory_space<vmem>>, %arg5: memref<1x128xf32, #tpu.memory_space<vmem>>, %arg6: memref<512x128xbf16, #tpu.memory_space<vmem>>) attributes {dimension_semantics = [#tpu.dimension_semantics<parallel>], iteration_bounds = array<i64: 2>, scalar_prefetch = 0 : i64, scratch_operands = 0 : i64, tpu.core_type = #tpu.core_type<tc>, window_params = [{transform_indices = @transform_0, window_bounds = array<i64: 512, 32>}, {pipeline_mode = #tpu.pipeline_mode<synchronous>, transform_indices = @transform_1, window_bounds = array<i64: 32, 128>}, {pipeline_mode = #tpu.pipeline_mode<synchronous>, transform_indices = @transform_2, window_bounds = array<i64: 1, 128>}, {pipeline_mode = #tpu.pipeline_mode<synchronous>, transform_indices = @transform_3, window_bounds = array<i64: 128, 128>}, {pipeline_mode = #tpu.pipeline_mode<synchronous>, transform_indices = @transform_4, window_bounds = array<i64: 1, 128>}, {transform_indices = @transform_5, window_bounds = array<i64: 512, 128>}]} {
    %c0 = arith.constant 0 : index
    %c0_0 = arith.constant 0 : index
    %0 = vector.load %arg1[%c0, %c0_0] : memref<512x32xf32, #tpu.memory_space<vmem>>, vector<512x32xf32>
    %1 = arith.truncf %0 : vector<512x32xf32> to vector<512x32xbf16>
    %c0_1 = arith.constant 0 : index
    %c0_2 = arith.constant 0 : index
    %2 = vector.load %arg2[%c0_1, %c0_2] : memref<32x128xbf16, #tpu.memory_space<vmem>>, vector<32x128xbf16>
    %cst = arith.constant dense<0.000000e+00> : vector<512x128xf32>
    %3 = tpu.matmul %1, %2, %cst {dimension_numbers = #tpu.dot_dimension_numbers<[1], [0], [0], [1], [0, 0, 1, 1], [], []>} : vector<512x32xbf16>, vector<32x128xbf16>, vector<512x128xf32> -> vector<512x128xf32>
    %c0_3 = arith.constant 0 : index
    %c0_4 = arith.constant 0 : index
    %4 = vector.load %arg3[%c0_3, %c0_4] : memref<1x128xf32, #tpu.memory_space<vmem>>, vector<1x128xf32>
    %5 = vector.broadcast %4 : vector<1x128xf32> to vector<512x128xf32>
    %6 = arith.addf %3, %5 : vector<512x128xf32>
    %cst_5 = arith.constant 0.000000e+00 : f32
    %7 = vector.broadcast %cst_5 : f32 to vector<512x128xf32>
    %8 = arith.maximumf %6, %7 : vector<512x128xf32>
    %9 = arith.truncf %8 : vector<512x128xf32> to vector<512x128xbf16>
    %c0_6 = arith.constant 0 : index
    %c0_7 = arith.constant 0 : index
    %10 = vector.load %arg4[%c0_6, %c0_7] : memref<128x128xbf16, #tpu.memory_space<vmem>>, vector<128x128xbf16>
    %cst_8 = arith.constant dense<0.000000e+00> : vector<512x128xf32>
    %11 = tpu.matmul %9, %10, %cst_8 {dimension_numbers = #tpu.dot_dimension_numbers<[1], [0], [0], [1], [0, 0, 1, 1], [], []>} : vector<512x128xbf16>, vector<128x128xbf16>, vector<512x128xf32> -> vector<512x128xf32>
    %c0_9 = arith.constant 0 : index
    %c0_10 = arith.constant 0 : index
    %12 = vector.load %arg5[%c0_9, %c0_10] : memref<1x128xf32, #tpu.memory_space<vmem>>, vector<1x128xf32>
    %13 = vector.broadcast %12 : vector<1x128xf32> to vector<512x128xf32>
    %14 = arith.addf %11, %13 : vector<512x128xf32>
    %15 = arith.truncf %14 : vector<512x128xf32> to vector<512x128xbf16>
    %c0_11 = arith.constant 0 : index
    %c0_12 = arith.constant 0 : index
    %16 = vector.load %arg6[%c0_11, %c0_12] : memref<512x128xbf16, #tpu.memory_space<vmem>>, vector<512x128xbf16>
    tpu.vector_store %arg6[%c0_11, %c0_12], %15 {strides = array<i32>} : memref<512x128xbf16, #tpu.memory_space<vmem>>, vector<512x128xbf16>,
    return
  }
  func.func @transform_0(%arg0: i32) -> (i32, i32) {
    %c0_i32 = arith.constant 0 : i32
    %c0_i32_0 = arith.constant 0 : i32
    return %arg0, %c0_i32 : i32, i32
  }
  func.func @transform_1(%arg0: i32) -> (i32, i32) {
    %c0_i32 = arith.constant 0 : i32
    %c0_i32_0 = arith.constant 0 : i32
    %c0_i32_1 = arith.constant 0 : i32
    return %c0_i32, %c0_i32_0 : i32, i32
  }
  func.func @transform_2(%arg0: i32) -> (i32, i32) {
    %c0_i32 = arith.constant 0 : i32
    %c0_i32_0 = arith.constant 0 : i32
    %c0_i32_1 = arith.constant 0 : i32
    return %c0_i32, %c0_i32_0 : i32, i32
  }
  func.func @transform_3(%arg0: i32) -> (i32, i32) {
    %c0_i32 = arith.constant 0 : i32
    %c0_i32_0 = arith.constant 0 : i32
    %c0_i32_1 = arith.constant 0 : i32
    return %c0_i32, %c0_i32_0 : i32, i32
  }
  func.func @transform_4(%arg0: i32) -> (i32, i32) {
    %c0_i32 = arith.constant 0 : i32
    %c0_i32_0 = arith.constant 0 : i32
    %c0_i32_1 = arith.constant 0 : i32
    return %c0_i32, %c0_i32_0 : i32, i32
  }
  func.func @transform_5(%arg0: i32) -> (i32, i32) {
    %c0_i32 = arith.constant 0 : i32
    %c0_i32_0 = arith.constant 0 : i32
    return %arg0, %c0_i32 : i32, i32
  }
}

</mosaic_0001>

<bundles_post_ra>
// kernel: tpu_custom_call.1
= control target key start
LH: loop header
LB: loop body
LE: loop exit
PB: predicated region body
PF: predicated region fallthrough
CT: control target
= control target key end

     0   :  { %10 = vsyncpa [#allocation3], 0  ;;  %s2753_s0 = inlined_call_operand.vmem [shape: f32[1024,32], index: 0, kind: input, shape index: {}]   ;;  %s2754_s1 = inlined_call_operand.vmem [shape: bf16[32,128], index: 1, kind: input, shape index: {}]   ;;  %s2755_s2 = inlined_call_operand.vmem [shape: f32[1,128], index: 2, kind: input, shape index: {}]   ;;  %s2756_s3 = inlined_call_operand.vmem [shape: bf16[128,128], index: 3, kind: input, shape index: {}]   ;;  %s2757_s4 = inlined_call_operand.vmem [shape: f32[1,128], index: 4, kind: input, shape index: {}]   ;;  %s2758_s5 = inlined_call_operand.hbm [shape: bf16[1024,128], index: 5, kind: output, shape index: {}]  }
   0x1   :  { %12 = vsyncpa [#allocation3 + $0x1], 0  ;;  %s2346_s18 = smov 0   ;;  %s2348_s19 = smov 0  }
   0x2   :  { %s2350_s20 = smov 0   ;;  %s2352_s21 = smov 0  }
   0x3 LB: > { %s2367_s22 = sadd.s32 4294967295, %s2311_s21   ;;  %s1584_s23 = sadd.s32 4294967294, %s2311_s21   ;;  %s2311_s21 = sphi %s2352_s21, %s2764_s21   ;;  %s2307_s20 = sphi %s2350_s20, %s2763_s20   ;;  %s2303_s19 = sphi %s2348_s19, %s2762_s19   ;;  %s2299_s18 = sphi %s2346_s18, %s2761_s18  }
   0x4   : > { %s2371_s24 = sadd.s32 1, %s2311_s21   ;;  %s135_s25 = sadd.s32 1, %s2307_s20 }
   0x5   : > { %s132_s26 = ssub.s32 %s2311_s21, %s2371_s24  ;;  %p145_p0 = scmp.ne.s32.totalorder %s2307_s20, %s2303_s19 }
   0x6   : > { %p133_p1 = scmp.eq.s32.totalorder %s132_s26, 0  ;;  %p146_p2 = scmp.eq.s32.totalorder %s2367_s22, 1 }
   0x7   : > { %p151_p3 = scmp.ne.s32.totalorder %s2303_s19, %s2299_s18  ;;  %p152_p4 = scmp.eq.s32.totalorder %s1584_s23, 1 }
   0x8   : > { %s2382_s27 = scalar_select %p133_p1, %s2307_s20, %s135_s25  }
   0x9   : > { %p2384_p5 = por %p146_p2, %p145_p0  ;;  %p2388_p6 = por %p152_p4, %p151_p3 }
   0xa   : > { %p1587_p7 = scmp.ge.s32.totalorder %s2311_s21, 1  ;;  %p191_p8 = scmp.lt.s32.totalorder %s2311_s21, 3 }
   0xc   : > { %p192_p9 = pnand %p1587_p7, %p191_p8 }
   0xd   : > { %v2239_v0 = vld [vmem:[%s2754_s1] sm:$0xff] (!%p192_p9)   ;;  %s1589_s7 = sshll.u32 (!%p192_p9), %s2367_s22, 6  ;;  %v2240_v1 = vld [vmem:[%s2754_s1 + $0x8] sm:$0xff] (!%p192_p9)   ;;  %vm346_vm0 = vcmask (!%p192_p9), 261120   ;;  %v2243_v13 = vld [vmem:[%s2756_s3 + $0x10] sm:$0xff] (!%p192_p9)   ;;  %s216_s16 = sand.u32 (!%p192_p9), 1, %s2303_s19  }
   0xe   : > { %195 = sbr.rel (%p192_p9) target bundleno = 604 (0x25c), region = 40  ;;  %p220_p10 = scmp.lt.s32.totalorder (!%p192_p9), %s1589_s7, 127  ;;  %2034 = vmatprep.subr.bf16.mxu0 (!%p192_p9), %v2239_v0  ;;  %v2241_v2 = vld [vmem:[%s2756_s3] sm:$0xff] (!%p192_p9)   ;;  %v2242_v3 = vld [vmem:[%s2756_s3 + $0x8] sm:$0xff] (!%p192_p9)   ;;  %v2244_v18 = vld [vmem:[%s2756_s3 + $0x18] sm:$0xff] (!%p192_p9)  }
   0xf   : > { %2035 = vmatpush3.bf16.msra.mxu0 (!%p192_p9), %v2239_v0  ;;  %2182 = vmatprep.subr.bf16.mxu1 (!%p192_p9), %v2241_v2  ;;  %v2245_v31 = vld [vmem:[%s2756_s3 + $0x20] sm:$0xff] (!%p192_p9)   ;;  %v2246_v32 = vld [vmem:[%s2756_s3 + $0x28] sm:$0xff] (!%p192_p9)   ;;  %s1588_s25 = sshll.u32 (!%p192_p9), %s216_s16, 8  ;;  %s1768_s30 = sshll.u32 (!%p192_p9), %s2367_s22, 12 }
  0x10   : > { %2036 = vmatprep.subr.bf16.mxu0 (!%p192_p9), %v2240_v1  ;;  %2190 = vmatpush3.bf16.msra.mxu1 (!%p192_p9), %v2241_v2  ;;  %s2607_s26 = scalar_lea.vmem (!%p192_p9), [#allocation2], %s1588_s25  ;;  %s2704_s9 = scalar_lea.hbm (!%p192_p9), %s2758_s5, %s1768_s30 }
  0x11   : > { %2183 = vmatprep.subr.bf16.mxu1 (!%p192_p9), %v2242_v3  ;;  %s1522_s6 = sshll.u32 (!%p192_p9), %s2607_s26, 4  ;;  %s2712_s22 = scalar_lea.sflag (!%p192_p9), [#allocation3], %s216_s16  ;;  %s2706_s6 = int_to_ptr.vmem [resolvable:$true] %s1522_s6 }
  0x12   : > { %s2249_s10 = scalar_lea.vmem (!%p192_p9), %s2706_s6, 4096  ;;  %s2313_s11 = smov (!%p192_p9), [#allocation2]  }
  0x13   : > { %2037 = vmatpush3.bf16.msra.mxu0 (!%p192_p9), %v2240_v1  ;;  %p2250_p11 = scmp.ne.s32.totalorder (!%p192_p9), %s2706_s6, %s2249_s10 }
  0x14   : > { %2102 = vmatprep.subr.bf16.mxu0 (!%p192_p9), %v2241_v2  ;;  %2191 = vmatpush3.bf16.msra.mxu1 (!%p192_p9), %v2242_v3 }
  0x15   : > { %s2766_s7 = smov (!%p220_p10, %s1589_s7), 127  ;;  %2184 = vmatprep.subr.bf16.mxu1 %v2243_v13  ;;  %p2251_p12 = pnand %p2250_p11, %p2384_p5 }
  0x16   : > { %s1590_s12 = sshll.u32 %s2766_s7, 3 }
  0x17   : > { %s2410_s17 = scalar_lea.vmem %s2753_s0, %s1590_s12  ;;  %p2252_p13 = pneg %p2251_p12 }
  0x18   : > { %v227_v4 = vld [vmem:[%s2410_s17] sm:$0xff]  ;;  %v228_v5 = vld [vmem:[%s2410_s17 + $0x8] sm:$0xff]  ;;  %v229_v6 = vld [vmem:[%s2410_s17 + $0x10] sm:$0xff]  ;;  %2192 = vmatpush3.bf16.msra.mxu1 %v2243_v13  ;;  %s2253_s12 = sshll.u32 %s2313_s11, 4  ;;  %s2254_s12 = int_to_ptr.vmem [resolvable:$false] %s2253_s12 }
  0x19   : > { %v291_v7 = vpack.c.bf16 %v228_v5, %v227_v4  ;;  %v230_v8 = vld [vmem:[%s2410_s17 + $0x18] sm:$0xff]  ;;  %v231_v9 = vld [vmem:[%s2410_s17 + $0x20] sm:$0xff]  ;;  %v232_v10 = vld [vmem:[%s2410_s17 + $0x28] sm:$0xff]  ;;  %2185 = vmatprep.subr.bf16.mxu1 %v2244_v18  ;;  %s2255_s13 = scalar_lea.vmem %s2254_s12, 8192  ;;  %p2256_p0 = scmp.lt.s32.totalorder %s2706_s6, %s2254_s12 }
  0x1a   : > { %v292_v11 = vpack.c.bf16 %v230_v8, %v229_v6  ;;  %v293_v12 = vpack.c.bf16 %v232_v10, %v231_v9  ;;  %v233_v14 = vld [vmem:[%s2410_s17 + $0x30] sm:$0xff]  ;;  %v234_v15 = vld [vmem:[%s2410_s17 + $0x38] sm:$0xff]  ;;  %v235_v16 = vld [vmem:[%s2410_s17 + $0x40] sm:$0xff]  ;;  %p2257_p1 = scmp.lt.s32.totalorder %s2255_s13, %s2249_s10 }
  0x1b   : > { %2038 = vmatprep.mubr.msk.bf16.mxu0 %vm346_vm0, %v291_v7  ;;  %v236_v17 = vld [vmem:[%s2410_s17 + $0x48] sm:$0xff]  ;;  %v294_v19 = vpack.c.bf16 %v234_v15, %v233_v14  ;;  %v237_v21 = vld [vmem:[%s2410_s17 + $0x50] sm:$0xff]  ;;  %v238_v22 = vld [vmem:[%s2410_s17 + $0x58] sm:$0xff] }
  0x1c   : > { %2039 = vmatmul.mubr.msk.bf16.vlgmr.msra.gmra.mrb[0].mxu0 %vm346_vm0, %v292_v11  ;;  %v295_v20 = vpack.c.bf16 %v236_v17, %v235_v16  ;;  %2193 = vmatpush3.bf16.msra.mxu1 %v2244_v18  ;;  %v239_v23 = vld [vmem:[%s2410_s17 + $0x60] sm:$0xff]  ;;  %v240_v24 = vld [vmem:[%s2410_s17 + $0x68] sm:$0xff]  ;;  %v296_v25 = vpack.c.bf16 %v238_v22, %v237_v21  ;;  %v241_v27 = vld [vmem:[%s2410_s17 + $0x70] sm:$0xff]  ;;  %p2258_p2 = por %p2257_p1, %p2256_p0 }
  0x1d   : > { %2042 = vmatprep.mubr.msk.bf16.mxu0 %vm346_vm0, %v293_v12  ;;  %2103 = vmatpush3.bf16.msra.mxu0 %v2241_v2  ;;  %v297_v26 = vpack.c.bf16 %v240_v24, %v239_v23  ;;  %v242_v28 = vld [vmem:[%s2410_s17 + $0x78] sm:$0xff]  ;;  %v243_v29 = vld [vmem:[%s2410_s17 + $0x80] sm:$0xff]  ;;  %v244_v30 = vld [vmem:[%s2410_s17 + $0x88] sm:$0xff] }
  0x1e   : > { %2104 = vmatprep.subr.bf16.mxu0 %v2242_v3  ;;  %2186 = vmatprep.subr.bf16.mxu1 %v2245_v31  ;;  %v298_v33 = vpack.c.bf16 %v242_v28, %v241_v27  ;;  %v299_v34 = vpack.c.bf16 %v244_v30, %v243_v29  ;;  %v245_v35 = vld [vmem:[%s2410_s17 + $0x90] sm:$0xff]  ;;  %v246_v36 = vld [vmem:[%s2410_s17 + $0x98] sm:$0xff]  ;;  %v247_v37 = vld [vmem:[%s2410_s17 + $0xa0] sm:$0xff]  ;;  %p2259_p3 = pnand %p2258_p2, %p2252_p13 }
  0x1f   : > { %v248_v38 = vld [vmem:[%s2410_s17 + $0xa8] sm:$0xff]  ;;  %v300_v39 = vpack.c.bf16 %v246_v36, %v245_v35  ;;  %v249_v41 = vld [vmem:[%s2410_s17 + $0xb0] sm:$0xff]  ;;  %v250_v42 = vld [vmem:[%s2410_s17 + $0xb8] sm:$0xff] }
  0x20   : > { %2194 = vmatpush3.bf16.msra.mxu1 %v2245_v31  ;;  %v301_v40 = vpack.c.bf16 %v248_v38, %v247_v37  ;;  %v251_v43 = vld [vmem:[%s2410_s17 + $0xc0] sm:$0xff]  ;;  %v252_v44 = vld [vmem:[%s2410_s17 + $0xc8] sm:$0xff]  ;;  %v302_v45 = vpack.c.bf16 %v250_v42, %v249_v41  ;;  %v253_v47 = vld [vmem:[%s2410_s17 + $0xd0] sm:$0xff] }
  0x21   : > { %2105 = vmatpush3.bf16.msra.mxu0 %v2242_v3  ;;  %2187 = vmatprep.subr.bf16.mxu1 %v2246_v32  ;;  %v303_v46 = vpack.c.bf16 %v252_v44, %v251_v43  ;;  %v254_v48 = vld [vmem:[%s2410_s17 + $0xd8] sm:$0xff]  ;;  %v255_v49 = vld [vmem:[%s2410_s17 + $0xe0] sm:$0xff]  ;;  %v256_v50 = vld [vmem:[%s2410_s17 + $0xe8] sm:$0xff] }
  0x22   : > { %2106 = vmatprep.subr.bf16.mxu0 %v2243_v13  ;;  %v304_v51 = vpack.c.bf16 %v254_v48, %v253_v47  ;;  %v305_v52 = vpack.c.bf16 %v256_v50, %v255_v49  ;;  %v257_v53 = vld [vmem:[%s2410_s17 + $0xf0] sm:$0xff]  ;;  %v258_v54 = vld [vmem:[%s2410_s17 + $0xf8] sm:$0xff]  ;;  %v259_v55 = vld [vmem:[%s2410_s17 + $0x100] sm:$0xff] }
  0x23   : > { %v260_v56 = vld [vmem:[%s2410_s17 + $0x108] sm:$0xff]  ;;  %v306_v57 = vpack.c.bf16 %v258_v54, %v257_v53  ;;  %v261_v59 = vld [vmem:[%s2410_s17 + $0x110] sm:$0xff]  ;;  %v262_v60 = vld [vmem:[%s2410_s17 + $0x118] sm:$0xff] }
  0x24   : > { %2043 = vmatmul.mubr.msk.bf16.gmra.mrb[4].mxu0 %vm346_vm0, %v294_v19  ;;  %2195 = vmatpush3.bf16.msra.mxu1 %v2246_v32  ;;  %v307_v58 = vpack.c.bf16 %v260_v56, %v259_v55  ;;  %v263_v61 = vld [vmem:[%s2410_s17 + $0x120] sm:$0xff]  ;;  %v264_v62 = vld [vmem:[%s2410_s17 + $0x128] sm:$0xff]  ;;  %v308_v63 = vpack.c.bf16 %v262_v60, %v261_v59  ;;  %v265_v1 = vld [vmem:[%s2410_s17 + $0x130] sm:$0xff] }
  0x25   : > { %2046 = vmatprep.mubr.msk.bf16.mxu0 %vm346_vm0, %v295_v20  ;;  %2107 = vmatpush3.bf16.msra.mxu0 %v2243_v13  ;;  %v309_v0 = vpack.c.bf16 %v264_v62, %v263_v61  ;;  %v266_v2 = vld [vmem:[%s2410_s17 + $0x138] sm:$0xff]  ;;  %v267_v3 = vld [vmem:[%s2410_s17 + $0x140] sm:$0xff]  ;;  %v268_v4 = vld [vmem:[%s2410_s17 + $0x148] sm:$0xff] }
  0x26   : > { %2108 = vmatprep.subr.bf16.mxu0 %v2244_v18  ;;  %v310_v5 = vpack.c.bf16 %v266_v2, %v265_v1  ;;  %v311_v6 = vpack.c.bf16 %v268_v4, %v267_v3  ;;  %v269_v7 = vld [vmem:[%s2410_s17 + $0x150] sm:$0xff]  ;;  %v270_v8 = vld [vmem:[%s2410_s17 + $0x158] sm:$0xff]  ;;  %v271_v9 = vld [vmem:[%s2410_s17 + $0x160] sm:$0xff] }
  0x27   : > { %v272_v10 = vld [vmem:[%s2410_s17 + $0x168] sm:$0xff]  ;;  %v312_v11 = vpack.c.bf16 %v270_v8, %v269_v7  ;;  %v273_v13 = vld [vmem:[%s2410_s17 + $0x170] sm:$0xff]  ;;  %v274_v14 = vld [vmem:[%s2410_s17 + $0x178] sm:$0xff] }
  0x28   : > { %v313_v12 = vpack.c.bf16 %v272_v10, %v271_v9  ;;  %v275_v15 = vld [vmem:[%s2410_s17 + $0x180] sm:$0xff]  ;;  %v276_v16 = vld [vmem:[%s2410_s17 + $0x188] sm:$0xff]  ;;  %v314_v17 = vpack.c.bf16 %v274_v14, %v273_v13  ;;  %v2248_v20 = vld [vmem:[%s2756_s3 + $0x38] sm:$0xff]  }
  0x29   : > { %2109 = vmatpush3.bf16.msra.mxu0 %v2244_v18  ;;  %v2247_v18 = vld [vmem:[%s2756_s3 + $0x30] sm:$0xff]   ;;  %v315_v19 = vpack.c.bf16 %v276_v16, %v275_v15  ;;  %v278_v22 = vld [vmem:[%s2410_s17 + $0x198] sm:$0xff]  ;;  %v279_v23 = vld [vmem:[%s2410_s17 + $0x1a0] sm:$0xff] }
  0x2a   : > { %2110 = vmatprep.subr.bf16.mxu0 %v2245_v31  ;;  %2188 = vmatprep.subr.bf16.mxu1 %v2247_v18  ;;  %v277_v21 = vld [vmem:[%s2410_s17 + $0x190] sm:$0xff]  ;;  %v280_v24 = vld [vmem:[%s2410_s17 + $0x1a8] sm:$0xff]  ;;  %v282_v28 = vld [vmem:[%s2410_s17 + $0x1b8] sm:$0xff] }
  0x2b   : > { %2196 = vmatpush3.bf16.msra.mxu1 %v2247_v18  ;;  %v281_v27 = vld [vmem:[%s2410_s17 + $0x1b0] sm:$0xff]  ;;  %v283_v29 = vld [vmem:[%s2410_s17 + $0x1c0] sm:$0xff]  ;;  %v284_v30 = vld [vmem:[%s2410_s17 + $0x1c8] sm:$0xff] }
  0x2c   : > { %2047 = vmatmul.mubr.msk.bf16.gmra.mrb[8].mxu0 %vm346_vm0, %v296_v25  ;;  %2189 = vmatprep.subr.bf16.mxu1 %v2248_v20  ;;  %v316_v25 = vpack.c.bf16 %v278_v22, %v277_v21  ;;  %v287_v35 = vld [vmem:[%s2410_s17 + $0x1e0] sm:$0xff]  ;;  %v288_v36 = vld [vmem:[%s2410_s17 + $0x1e8] sm:$0xff] }
  0x2d   : > { %2050 = vmatprep.mubr.msk.bf16.mxu0 %vm346_vm0, %v297_v26  ;;  %2111 = vmatpush3.bf16.msra.mxu0 %v2245_v31  ;;  %v317_v26 = vpack.c.bf16 %v280_v24, %v279_v23  ;;  %v318_v31 = vpack.c.bf16 %v282_v28, %v281_v27  ;;  %v321_v38 = vpack.c.bf16 %v288_v36, %v287_v35  ;;  %v2529_v42 = vld [vmem:[%s2755_s2] ss:$0 sm:$0xff] }
  0x2e   : > { %2112 = vmatprep.subr.bf16.mxu0 %v2246_v32 }
  0x2f   : > { %2197 = vmatpush3.bf16.msra.mxu1 %v2248_v20 }
  0x31   : > { %2113 = vmatpush3.bf16.msra.mxu0 %v2246_v32  ;;  %v319_v32 = vpack.c.bf16 %v284_v30, %v283_v29 }
  0x32   : > { %2114 = vmatprep.subr.bf16.mxu0 %v2247_v18 }
  0x34   : > { %2051 = vmatmul.mubr.msk.bf16.gmra.mrb[12].mxu0 %vm346_vm0, %v298_v33  ;;  %v285_v33 = vld [vmem:[%s2410_s17 + $0x1d0] sm:$0xff] }
  0x35   : > { %2054 = vmatprep.mubr.msk.bf16.mxu0 %vm346_vm0, %v299_v34  ;;  %2115 = vmatpush3.bf16.msra.mxu0 %v2247_v18  ;;  %v286_v34 = vld [vmem:[%s2410_s17 + $0x1d8] sm:$0xff] }
  0x36   : > { %2116 = vmatprep.subr.bf16.mxu0 %v2248_v20  ;;  %v320_v37 = vpack.c.bf16 %v286_v34, %v285_v33 }
  0x39   : > { %2117 = vmatpush3.bf16.msra.mxu0 %v2248_v20 }
  0x3c   : > { %2055 = vmatmul.mubr.msk.bf16.gmra.mrb[16].mxu0 %vm346_vm0, %v300_v39  ;;  %v289_v39 = vld [vmem:[%s2410_s17 + $0x1f0] sm:$0xff] }
  0x3d   : > { %2058 = vmatprep.mubr.msk.bf16.mxu0 %vm346_vm0, %v301_v40  ;;  %v290_v40 = vld [vmem:[%s2410_s17 + $0x1f8] sm:$0xff] }
  0x3e   : > { %v322_v41 = vpack.c.bf16 %v290_v40, %v289_v39 }
  0x44   : > { %2059 = vmatmul.mubr.msk.bf16.gmra.mrb[20].mxu0 %vm346_vm0, %v302_v45 }
  0x45   : > { %2062 = vmatprep.mubr.msk.bf16.mxu0 %vm346_vm0, %v303_v46 }
  0x4c   : > { %2063 = vmatmul.mubr.msk.bf16.gmra.mrb[24].mxu0 %vm346_vm0, %v304_v51 }
  0x4d   : > { %2066 = vmatprep.mubr.msk.bf16.mxu0 %vm346_vm0, %v305_v52 }
  0x54   : > { %2067 = vmatmul.mubr.msk.bf16.gmra.mrb[28].mxu0 %vm346_vm0, %v306_v57 }
  0x55   : > { %2070 = vmatprep.mubr.msk.bf16.mxu0 %vm346_vm0, %v307_v58 }
  0x5c   : > { %2071 = vmatmul.mubr.msk.bf16.gmra.mrb[32].mxu0 %vm346_vm0, %v308_v63 }
  0x5d   : > { %2074 = vmatprep.mubr.msk.bf16.mxu0 %vm346_vm0, %v309_v0 }
  0x64   : > { %2075 = vmatmul.mubr.msk.bf16.gmra.mrb[36].mxu0 %vm346_vm0, %v310_v5 }
  0x65   : > { %2078 = vmatprep.mubr.msk.bf16.mxu0 %vm346_vm0, %v311_v6 }
  0x6c   : > { %2079 = vmatmul.mubr.msk.bf16.gmra.mrb[40].mxu0 %vm346_vm0, %v312_v11 }
  0x6d   : > { %2082 = vmatprep.mubr.msk.bf16.mxu0 %vm346_vm0, %v313_v12 }
  0x74   : > { %2083 = vmatmul.mubr.msk.bf16.gmra.mrb[44].mxu0 %vm346_vm0, %v314_v17 }
  0x75   : > { %2086 = vmatprep.mubr.msk.bf16.mxu0 %vm346_vm0, %v315_v19 }
  0x7c   : > { %2087 = vmatmul.mubr.msk.bf16.gmra.mrb[48].mxu0 %vm346_vm0, %v316_v25 }
  0x7d   : > { %2090 = vmatprep.mubr.msk.bf16.mxu0 %vm346_vm0, %v317_v26 }
  0x84   : > { %2091 = vmatmul.mubr.msk.bf16.gmra.mrb[52].mxu0 %vm346_vm0, %v318_v31 }
  0x85   : > { %2094 = vmatprep.mubr.msk.bf16.mxu0 %vm346_vm0, %v319_v32 }
  0x8c   : > { %2095 = vmatmul.mubr.msk.bf16.gmra.mrb[56].mxu0 %vm346_vm0, %v320_v37 }
  0x8d   : > { %2098 = vmatprep.mubr.msk.bf16.mxu0 %vm346_vm0, %v321_v38 }
  0x94   : > { %2099 = vmatmul.mubr.msk.bf16.gmra.mrb[60].mxu0 %vm346_vm0, %v322_v41 }
  0xef   : > { %v2040_v43 = vpop.f32.mrb[0].mxu0 }
  0xf0   : > { %v486_v44 = vadd.f32 %v2040_v43, %v2529_v42  ;;  %v477_v45 = vpop.f32.mrb[1].mxu0 }
  0xf1   : > { %v478_v46 = vadd.f32 %v2529_v42, %v477_v45  ;;  %v2041_v47 = vpop.f32.mrb[2].mxu0 }
  0xf2   : > { %v489_v48 = vadd.f32 %v2041_v47, %v2529_v42  ;;  %v480_v49 = vpop.f32.mrb[3].mxu0  ;;  %v734_v51 = vmax.f32 %v486_v44, 0.0 }
  0xf3   : > { %v481_v50 = vadd.f32 %v2529_v42, %v480_v49  ;;  %v732_v53 = vmax.f32 %v478_v46, 0.0 }
  0xf4   : > { %v735_v52 = vmax.f32 %v489_v48, 0.0 }
  0xf5   : > { %v733_v54 = vmax.f32 %v481_v50, 0.0 }
  0xf6   : > { %v797_v55 = vpack.c.bf16 %v735_v52, %v734_v51 }
  0xf7   : > { %v796_v56 = vpack.c.bf16 %v733_v54, %v732_v53  ;;  %v2044_v57 = vpop.f32.mrb[4].mxu0 }
  0xf8   : > { %v502_v58 = vadd.f32 %v2044_v57, %v2529_v42  ;;  %v493_v59 = vpop.f32.mrb[5].mxu0 }
  0xf9   : > { %v494_v60 = vadd.f32 %v2529_v42, %v493_v59  ;;  %v2045_v61 = vpop.f32.mrb[6].mxu0  ;;  %2118 = vmatprep.mubr.bf16.mxu0 %v796_v56 }
  0xfa   : > { %v505_v62 = vadd.f32 %v2045_v61, %v2529_v42  ;;  %v496_v63 = vpop.f32.mrb[7].mxu0  ;;  %2119 = vmatmul.mubr.bf16.vlgmr.msra.gmra.mrb[64].mxu0 %v797_v55  ;;  %v738_v1 = vmax.f32 %v502_v58, 0.0 }
  0xfb   : > { %v497_v0 = vadd.f32 %v2529_v42, %v496_v63  ;;  %v736_v3 = vmax.f32 %v494_v60, 0.0 }
  0xfc   : > { %v739_v2 = vmax.f32 %v505_v62, 0.0 }
  0xfd   : > { %v737_v4 = vmax.f32 %v497_v0, 0.0 }
  0xfe   : > { %v799_v5 = vpack.c.bf16 %v739_v2, %v738_v1 }
  0xff   : > { %v2048_v6 = vpop.f32.mrb[8].mxu0  ;;  %v798_v7 = vpack.c.bf16 %v737_v4, %v736_v3 }
 0x100   : > { %v518_v8 = vadd.f32 %v2048_v6, %v2529_v42  ;;  %v509_v9 = vpop.f32.mrb[9].mxu0 }
 0x101   : > { %v510_v10 = vadd.f32 %v2529_v42, %v509_v9  ;;  %v2049_v11 = vpop.f32.mrb[10].mxu0  ;;  %2122 = vmatprep.mubr.bf16.mxu1 %v798_v7 }
 0x102   : > { %v521_v12 = vadd.f32 %v2049_v11, %v2529_v42  ;;  %v512_v13 = vpop.f32.mrb[11].mxu0  ;;  %2123 = vmatmul.mubr.bf16.vlgmr.msra.gmra.mrb[0].mxu1 %v799_v5  ;;  %v742_v15 = vmax.f32 %v518_v8, 0.0 }
 0x103   : > { %v513_v14 = vadd.f32 %v2529_v42, %v512_v13  ;;  %v740_v17 = vmax.f32 %v510_v10, 0.0 }
 0x104   : > { %v743_v16 = vmax.f32 %v521_v12, 0.0 }
 0x105   : > { %v741_v18 = vmax.f32 %v513_v14, 0.0 }
 0x106   : > { %v801_v19 = vpack.c.bf16 %v743_v16, %v742_v15 }
 0x107   : > { %v800_v20 = vpack.c.bf16 %v741_v18, %v740_v17  ;;  %v2052_v21 = vpop.f32.mrb[12].mxu0 }
 0x108   : > { %v534_v22 = vadd.f32 %v2052_v21, %v2529_v42  ;;  %v525_v23 = vpop.f32.mrb[13].mxu0 }
 0x109   : > { %v526_v24 = vadd.f32 %v2529_v42, %v525_v23  ;;  %v2053_v25 = vpop.f32.mrb[14].mxu0  ;;  %2126 = vmatprep.mubr.bf16.mxu1 %v800_v20 }
 0x10a   : > { %v537_v26 = vadd.f32 %v2053_v25, %v2529_v42  ;;  %v528_v27 = vpop.f32.mrb[15].mxu0  ;;  %2127 = vmatmul.mubr.bf16.gmra.mrb[4].mxu1 %v801_v19  ;;  %v746_v29 = vmax.f32 %v534_v22, 0.0 }
 0x10b   : > { %v529_v28 = vadd.f32 %v2529_v42, %v528_v27  ;;  %v744_v31 = vmax.f32 %v526_v24, 0.0 }
 0x10c   : > { %v747_v30 = vmax.f32 %v537_v26, 0.0 }
 0x10d   : > { %v745_v32 = vmax.f32 %v529_v28, 0.0 }
 0x10e   : > { %v803_v33 = vpack.c.bf16 %v747_v30, %v746_v29 }
 0x10f   : > { %v802_v34 = vpack.c.bf16 %v745_v32, %v744_v31  ;;  %v2056_v35 = vpop.f32.mrb[16].mxu0 }
 0x110   : > { %v550_v36 = vadd.f32 %v2056_v35, %v2529_v42  ;;  %v541_v37 = vpop.f32.mrb[17].mxu0 }
 0x111   : > { %v542_v38 = vadd.f32 %v2529_v42, %v541_v37  ;;  %v2057_v39 = vpop.f32.mrb[18].mxu0  ;;  %2130 = vmatprep.mubr.bf16.mxu1 %v802_v34 }
 0x112   : > { %v553_v40 = vadd.f32 %v2057_v39, %v2529_v42  ;;  %v544_v41 = vpop.f32.mrb[19].mxu0  ;;  %2131 = vmatmul.mubr.bf16.gmra.mrb[8].mxu1 %v803_v33  ;;  %v750_v44 = vmax.f32 %v550_v36, 0.0 }
 0x113   : > { %v545_v43 = vadd.f32 %v2529_v42, %v544_v41  ;;  %v748_v46 = vmax.f32 %v542_v38, 0.0 }
 0x114   : > { %v751_v45 = vmax.f32 %v553_v40, 0.0 }
 0x115   : > { %v749_v47 = vmax.f32 %v545_v43, 0.0 }
 0x116   : > { %v805_v48 = vpack.c.bf16 %v751_v45, %v750_v44 }
 0x117   : > { %v804_v49 = vpack.c.bf16 %v749_v47, %v748_v46  ;;  %v2060_v50 = vpop.f32.mrb[20].mxu0 }
 0x118   : > { %v566_v51 = vadd.f32 %v2060_v50, %v2529_v42  ;;  %v557_v52 = vpop.f32.mrb[21].mxu0 }
 0x119   : > { %v558_v53 = vadd.f32 %v2529_v42, %v557_v52  ;;  %v2061_v54 = vpop.f32.mrb[22].mxu0  ;;  %2134 = vmatprep.mubr.bf16.mxu1 %v804_v49 }
 0x11a   : > { %v569_v55 = vadd.f32 %v2061_v54, %v2529_v42  ;;  %v560_v56 = vpop.f32.mrb[23].mxu0  ;;  %2135 = vmatmul.mubr.bf16.gmra.mrb[12].mxu1 %v805_v48  ;;  %v754_v58 = vmax.f32 %v566_v51, 0.0 }
 0x11b   : > { %v561_v57 = vadd.f32 %v2529_v42, %v560_v56  ;;  %v752_v60 = vmax.f32 %v558_v53, 0.0 }
 0x11c   : > { %v755_v59 = vmax.f32 %v569_v55, 0.0 }
 0x11d   : > { %v753_v61 = vmax.f32 %v561_v57, 0.0 }
 0x11e   : > { %v807_v62 = vpack.c.bf16 %v755_v59, %v754_v58 }
 0x11f   : > { %v806_v63 = vpack.c.bf16 %v753_v61, %v752_v60  ;;  %v2064_v0 = vpop.f32.mrb[24].mxu0 }
 0x120   : > { %v582_v1 = vadd.f32 %v2064_v0, %v2529_v42  ;;  %v573_v2 = vpop.f32.mrb[25].mxu0 }
 0x121   : > { %v574_v3 = vadd.f32 %v2529_v42, %v573_v2  ;;  %v2065_v4 = vpop.f32.mrb[26].mxu0  ;;  %2138 = vmatprep.mubr.bf16.mxu1 %v806_v63 }
 0x122   : > { %v585_v5 = vadd.f32 %v2065_v4, %v2529_v42  ;;  %v576_v6 = vpop.f32.mrb[27].mxu0  ;;  %2139 = vmatmul.mubr.bf16.gmra.mrb[16].mxu1 %v807_v62  ;;  %v758_v8 = vmax.f32 %v582_v1, 0.0 }
 0x123   : > { %v577_v7 = vadd.f32 %v2529_v42, %v576_v6  ;;  %v756_v10 = vmax.f32 %v574_v3, 0.0 }
 0x124   : > { %v759_v9 = vmax.f32 %v585_v5, 0.0 }
 0x125   : > { %v757_v11 = vmax.f32 %v577_v7, 0.0 }
 0x126   : > { %v809_v12 = vpack.c.bf16 %v759_v9, %v758_v8 }
 0x127   : > { %v808_v13 = vpack.c.bf16 %v757_v11, %v756_v10  ;;  %v2068_v14 = vpop.f32.mrb[28].mxu0 }
 0x128   : > { %v598_v15 = vadd.f32 %v2068_v14, %v2529_v42  ;;  %v589_v16 = vpop.f32.mrb[29].mxu0 }
 0x129   : > { %v590_v17 = vadd.f32 %v2529_v42, %v589_v16  ;;  %v2069_v18 = vpop.f32.mrb[30].mxu0  ;;  %2142 = vmatprep.mubr.bf16.mxu1 %v808_v13 }
 0x12a   : > { %v601_v19 = vadd.f32 %v2069_v18, %v2529_v42  ;;  %v592_v20 = vpop.f32.mrb[31].mxu0  ;;  %2143 = vmatmul.mubr.bf16.gmra.mrb[20].mxu1 %v809_v12  ;;  %v762_v22 = vmax.f32 %v598_v15, 0.0 }
 0x12b   : > { %v593_v21 = vadd.f32 %v2529_v42, %v592_v20  ;;  %v760_v24 = vmax.f32 %v590_v17, 0.0 }
 0x12c   : > { %v763_v23 = vmax.f32 %v601_v19, 0.0 }
 0x12d   : > { %v761_v25 = vmax.f32 %v593_v21, 0.0 }
 0x12e   : > { %v811_v26 = vpack.c.bf16 %v763_v23, %v762_v22 }
 0x12f   : > { %v810_v27 = vpack.c.bf16 %v761_v25, %v760_v24  ;;  %v2072_v28 = vpop.f32.mrb[32].mxu0 }
 0x130   : > { %v614_v29 = vadd.f32 %v2072_v28, %v2529_v42  ;;  %v605_v30 = vpop.f32.mrb[33].mxu0 }
 0x131   : > { %v606_v31 = vadd.f32 %v2529_v42, %v605_v30  ;;  %v2073_v32 = vpop.f32.mrb[34].mxu0  ;;  %2146 = vmatprep.mubr.bf16.mxu1 %v810_v27 }
 0x132   : > { %v617_v33 = vadd.f32 %v2073_v32, %v2529_v42  ;;  %v608_v34 = vpop.f32.mrb[35].mxu0  ;;  %2147 = vmatmul.mubr.bf16.gmra.mrb[24].mxu1 %v811_v26  ;;  %v766_v36 = vmax.f32 %v614_v29, 0.0 }
 0x133   : > { %v609_v35 = vadd.f32 %v2529_v42, %v608_v34  ;;  %v764_v38 = vmax.f32 %v606_v31, 0.0 }
 0x134   : > { %v767_v37 = vmax.f32 %v617_v33, 0.0 }
 0x135   : > { %v765_v39 = vmax.f32 %v609_v35, 0.0 }
 0x136   : > { %v813_v40 = vpack.c.bf16 %v767_v37, %v766_v36 }
 0x137   : > { %v812_v41 = vpack.c.bf16 %v765_v39, %v764_v38  ;;  %v2076_v43 = vpop.f32.mrb[36].mxu0 }
 0x138   : > { %v630_v44 = vadd.f32 %v2076_v43, %v2529_v42  ;;  %v621_v45 = vpop.f32.mrb[37].mxu0 }
 0x139   : > { %v622_v46 = vadd.f32 %v2529_v42, %v621_v45  ;;  %v2077_v47 = vpop.f32.mrb[38].mxu0  ;;  %2150 = vmatprep.mubr.bf16.mxu1 %v812_v41 }
 0x13a   : > { %v633_v48 = vadd.f32 %v2077_v47, %v2529_v42  ;;  %v624_v49 = vpop.f32.mrb[39].mxu0  ;;  %2151 = vmatmul.mubr.bf16.gmra.mrb[28].mxu1 %v813_v40  ;;  %v770_v51 = vmax.f32 %v630_v44, 0.0 }
 0x13b   : > { %v625_v50 = vadd.f32 %v2529_v42, %v624_v49  ;;  %v768_v53 = vmax.f32 %v622_v46, 0.0 }
 0x13c   : > { %v771_v52 = vmax.f32 %v633_v48, 0.0 }
 0x13d   : > { %v769_v54 = vmax.f32 %v625_v50, 0.0 }
 0x13e   : > { %v815_v55 = vpack.c.bf16 %v771_v52, %v770_v51 }
 0x13f   : > { %v814_v56 = vpack.c.bf16 %v769_v54, %v768_v53  ;;  %v2080_v57 = vpop.f32.mrb[40].mxu0 }
 0x140   : > { %v646_v58 = vadd.f32 %v2080_v57, %v2529_v42  ;;  %v637_v59 = vpop.f32.mrb[41].mxu0 }
 0x141   : > { %v638_v60 = vadd.f32 %v2529_v42, %v637_v59  ;;  %v2081_v61 = vpop.f32.mrb[42].mxu0  ;;  %2154 = vmatprep.mubr.bf16.mxu1 %v814_v56 }
 0x142   : > { %v649_v62 = vadd.f32 %v2081_v61, %v2529_v42  ;;  %v640_v63 = vpop.f32.mrb[43].mxu0  ;;  %2155 = vmatmul.mubr.bf16.gmra.mrb[32].mxu1 %v815_v55  ;;  %v774_v1 = vmax.f32 %v646_v58, 0.0 }
 0x143   : > { %v641_v0 = vadd.f32 %v2529_v42, %v640_v63  ;;  %v772_v3 = vmax.f32 %v638_v60, 0.0 }
 0x144   : > { %v775_v2 = vmax.f32 %v649_v62, 0.0 }
 0x145   : > { %v773_v4 = vmax.f32 %v641_v0, 0.0 }
 0x146   : > { %v817_v5 = vpack.c.bf16 %v775_v2, %v774_v1 }
 0x147   : > { %v816_v6 = vpack.c.bf16 %v773_v4, %v772_v3  ;;  %v2084_v7 = vpop.f32.mrb[44].mxu0 }
 0x148   : > { %v662_v8 = vadd.f32 %v2084_v7, %v2529_v42  ;;  %v653_v9 = vpop.f32.mrb[45].mxu0 }
 0x149   : > { %v654_v10 = vadd.f32 %v2529_v42, %v653_v9  ;;  %v2085_v11 = vpop.f32.mrb[46].mxu0  ;;  %2158 = vmatprep.mubr.bf16.mxu1 %v816_v6 }
 0x14a   : > { %v665_v12 = vadd.f32 %v2085_v11, %v2529_v42  ;;  %v656_v13 = vpop.f32.mrb[47].mxu0  ;;  %2159 = vmatmul.mubr.bf16.gmra.mrb[36].mxu1 %v817_v5  ;;  %v778_v15 = vmax.f32 %v662_v8, 0.0 }
 0x14b   : > { %v657_v14 = vadd.f32 %v2529_v42, %v656_v13  ;;  %v776_v17 = vmax.f32 %v654_v10, 0.0 }
 0x14c   : > { %v779_v16 = vmax.f32 %v665_v12, 0.0 }
 0x14d   : > { %v777_v18 = vmax.f32 %v657_v14, 0.0 }
 0x14e   : > { %v819_v19 = vpack.c.bf16 %v779_v16, %v778_v15  ;;  %v2599_v15 = vld [vmem:[%s2757_s4] ss:$0 sm:$0xff] }
 0x14f   : > { %v818_v20 = vpack.c.bf16 %v777_v18, %v776_v17  ;;  %v2088_v21 = vpop.f32.mrb[48].mxu0 }
 0x150   : > { %v678_v22 = vadd.f32 %v2088_v21, %v2529_v42  ;;  %v669_v23 = vpop.f32.mrb[49].mxu0 }
 0x151   : > { %v670_v24 = vadd.f32 %v2529_v42, %v669_v23  ;;  %v2089_v25 = vpop.f32.mrb[50].mxu0  ;;  %2162 = vmatprep.mubr.bf16.mxu1 %v818_v20 }
 0x152   : > { %v681_v26 = vadd.f32 %v2089_v25, %v2529_v42  ;;  %v672_v27 = vpop.f32.mrb[51].mxu0  ;;  %2163 = vmatmul.mubr.bf16.gmra.mrb[40].mxu1 %v819_v19  ;;  %v782_v29 = vmax.f32 %v678_v22, 0.0 }
 0x153   : > { %v673_v28 = vadd.f32 %v2529_v42, %v672_v27  ;;  %v780_v31 = vmax.f32 %v670_v24, 0.0 }
 0x154   : > { %v783_v30 = vmax.f32 %v681_v26, 0.0 }
 0x155   : > { %v781_v32 = vmax.f32 %v673_v28, 0.0 }
 0x156   : > { %v821_v33 = vpack.c.bf16 %v783_v30, %v782_v29 }
 0x157   : > { %v820_v34 = vpack.c.bf16 %v781_v32, %v780_v31  ;;  %v2092_v35 = vpop.f32.mrb[52].mxu0 }
 0x158   : > { %v694_v36 = vadd.f32 %v2092_v35, %v2529_v42  ;;  %v685_v37 = vpop.f32.mrb[53].mxu0 }
 0x159   : > { %v686_v38 = vadd.f32 %v2529_v42, %v685_v37  ;;  %v2093_v39 = vpop.f32.mrb[54].mxu0  ;;  %2166 = vmatprep.mubr.bf16.mxu1 %v820_v34 }
 0x15a   : > { %v697_v40 = vadd.f32 %v2093_v39, %v2529_v42  ;;  %v688_v41 = vpop.f32.mrb[55].mxu0  ;;  %2167 = vmatmul.mubr.bf16.gmra.mrb[44].mxu1 %v821_v33  ;;  %v786_v44 = vmax.f32 %v694_v36, 0.0 }
 0x15b   : > { %v689_v43 = vadd.f32 %v2529_v42, %v688_v41  ;;  %v784_v46 = vmax.f32 %v686_v38, 0.0 }
 0x15c   : > { %v787_v45 = vmax.f32 %v697_v40, 0.0 }
 0x15d   : > { %v785_v47 = vmax.f32 %v689_v43, 0.0 }
 0x15e   : > { %v823_v48 = vpack.c.bf16 %v787_v45, %v786_v44 }
 0x15f   : > { %v822_v49 = vpack.c.bf16 %v785_v47, %v784_v46  ;;  %v2096_v50 = vpop.f32.mrb[56].mxu0 }
 0x160   : > { %v710_v51 = vadd.f32 %v2096_v50, %v2529_v42  ;;  %v701_v52 = vpop.f32.mrb[57].mxu0 }
 0x161   : > { %v702_v53 = vadd.f32 %v2529_v42, %v701_v52  ;;  %v2097_v54 = vpop.f32.mrb[58].mxu0  ;;  %2170 = vmatprep.mubr.bf16.mxu1 %v822_v49 }
 0x162   : > { %v713_v55 = vadd.f32 %v2097_v54, %v2529_v42  ;;  %v704_v56 = vpop.f32.mrb[59].mxu0  ;;  %2171 = vmatmul.mubr.bf16.gmra.mrb[48].mxu1 %v823_v48  ;;  %v790_v58 = vmax.f32 %v710_v51, 0.0 }
 0x163   : > { %v705_v57 = vadd.f32 %v2529_v42, %v704_v56  ;;  %v788_v60 = vmax.f32 %v702_v53, 0.0 }
 0x164   : > { %v791_v59 = vmax.f32 %v713_v55, 0.0 }
 0x165   : > { %v789_v61 = vmax.f32 %v705_v57, 0.0 }
 0x166   : > { %v825_v62 = vpack.c.bf16 %v791_v59, %v790_v58 }
 0x167   : > { %v824_v63 = vpack.c.bf16 %v789_v61, %v788_v60  ;;  %v2100_v0 = vpop.f32.mrb[60].mxu0 }
 0x168   : > { %v726_v1 = vadd.f32 %v2100_v0, %v2529_v42  ;;  %v717_v2 = vpop.f32.mrb[61].mxu0 }
 0x169   : > { %v718_v3 = vadd.f32 %v2529_v42, %v717_v2  ;;  %v2101_v4 = vpop.f32.mrb[62].mxu0  ;;  %2174 = vmatprep.mubr.bf16.mxu1 %v824_v63 }
 0x16a   : > { %v729_v5 = vadd.f32 %v2101_v4, %v2529_v42  ;;  %v720_v6 = vpop.f32.mrb[63].mxu0  ;;  %2175 = vmatmul.mubr.bf16.gmra.mrb[52].mxu1 %v825_v62  ;;  %v794_v8 = vmax.f32 %v726_v1, 0.0 }
 0x16b   : > { %v721_v7 = vadd.f32 %v2529_v42, %v720_v6  ;;  %v792_v10 = vmax.f32 %v718_v3, 0.0 }
 0x16c   : > { %v795_v9 = vmax.f32 %v729_v5, 0.0 }
 0x16d   : > { %v793_v11 = vmax.f32 %v721_v7, 0.0 }
 0x16e   : > { %v827_v12 = vpack.c.bf16 %v795_v9, %v794_v8 }
 0x16f   : > { %v826_v13 = vpack.c.bf16 %v793_v11, %v792_v10 }
 0x171   : > { %2178 = vmatprep.mubr.bf16.mxu1 %v826_v13 }
 0x172   : > { %2179 = vmatmul.mubr.bf16.gmra.mrb[56].mxu1 %v827_v12 }
 0x1cd   : > { %v2120_v14 = vpop.f32.mrb[64].mxu0 }
 0x1ce   : > { %v933_v16 = vpop.f32.mrb[65].mxu0  ;;  %v942_v42 = vadd.f32 %v2120_v14, %v2599_v15 }
 0x1cf   : > { %v2121_v17 = vpop.f32.mrb[66].mxu0  ;;  %v934_v20 = vadd.f32 %v2599_v15, %v933_v16 }
 0x1d0   : > { %v945_v18 = vadd.f32 %v2121_v17, %v2599_v15  ;;  %v936_v19 = vpop.f32.mrb[67].mxu0 }
 0x1d1   : > { %v937_v21 = vadd.f32 %v2599_v15, %v936_v19 }
 0x1d2   : > { %v1777_v22 = vpack.c.bf16 %v945_v18, %v942_v42 }
 0x1d3   : > { %v1772_v23 = vpack.c.bf16 %v937_v21, %v934_v20 }
 0x1d4   : > { %1929 = vst [vmem:[%s2607_s26 + $0x8] sm:$0xff] %v1777_v22  }
 0x1d5   : > { %1773 = vst [vmem:[%s2607_s26] sm:$0xff] %v1772_v23   ;;  %v2124_v24 = vpop.f32.mrb[0].mxu1 }
 0x1d6   : > { %v949_v25 = vpop.f32.mrb[1].mxu1  ;;  %v958_v27 = vadd.f32 %v2124_v24, %v2599_v15 }
 0x1d7   : > { %v2125_v26 = vpop.f32.mrb[2].mxu1  ;;  %v950_v30 = vadd.f32 %v2599_v15, %v949_v25 }
 0x1d8   : > { %v961_v28 = vadd.f32 %v2125_v26, %v2599_v15  ;;  %v952_v29 = vpop.f32.mrb[3].mxu1 }
 0x1d9   : > { %v953_v31 = vadd.f32 %v2599_v15, %v952_v29 }
 0x1da   : > { %v1787_v32 = vpack.c.bf16 %v961_v28, %v958_v27 }
 0x1db   : > { %v1782_v33 = vpack.c.bf16 %v953_v31, %v950_v30 }
 0x1dc   : > { %1931 = vst [vmem:[%s2607_s26 + $0x18] sm:$0xff] %v1787_v32  }
 0x1dd   : > { %1930 = vst [vmem:[%s2607_s26 + $0x10] sm:$0xff] %v1782_v33   ;;  %v2128_v34 = vpop.f32.mrb[4].mxu1 }
 0x1de   : > { %v965_v35 = vpop.f32.mrb[5].mxu1  ;;  %v974_v37 = vadd.f32 %v2128_v34, %v2599_v15 }
 0x1df   : > { %v2129_v36 = vpop.f32.mrb[6].mxu1  ;;  %v966_v40 = vadd.f32 %v2599_v15, %v965_v35 }
 0x1e0   : > { %v977_v38 = vadd.f32 %v2129_v36, %v2599_v15  ;;  %v968_v39 = vpop.f32.mrb[7].mxu1 }
 0x1e1   : > { %v969_v41 = vadd.f32 %v2599_v15, %v968_v39 }
 0x1e2   : > { %v1797_v43 = vpack.c.bf16 %v977_v38, %v974_v37 }
 0x1e3   : > { %v1792_v44 = vpack.c.bf16 %v969_v41, %v966_v40 }
 0x1e4   : > { %1933 = vst [vmem:[%s2607_s26 + $0x28] sm:$0xff] %v1797_v43  }
 0x1e5   : > { %1932 = vst [vmem:[%s2607_s26 + $0x20] sm:$0xff] %v1792_v44   ;;  %v2132_v45 = vpop.f32.mrb[8].mxu1 }
 0x1e6   : > { %v981_v46 = vpop.f32.mrb[9].mxu1  ;;  %v990_v48 = vadd.f32 %v2132_v45, %v2599_v15 }
 0x1e7   : > { %v2133_v47 = vpop.f32.mrb[10].mxu1  ;;  %v982_v51 = vadd.f32 %v2599_v15, %v981_v46 }
 0x1e8   : > { %v993_v49 = vadd.f32 %v2133_v47, %v2599_v15  ;;  %v984_v50 = vpop.f32.mrb[11].mxu1 }
 0x1e9   : > { %v985_v52 = vadd.f32 %v2599_v15, %v984_v50 }
 0x1ea   : > { %v1807_v53 = vpack.c.bf16 %v993_v49, %v990_v48 }
 0x1eb   : > { %v1802_v54 = vpack.c.bf16 %v985_v52, %v982_v51 }
 0x1ec   : > { %1935 = vst [vmem:[%s2607_s26 + $0x38] sm:$0xff] %v1807_v53  }
 0x1ed   : > { %1934 = vst [vmem:[%s2607_s26 + $0x30] sm:$0xff] %v1802_v54   ;;  %v2136_v55 = vpop.f32.mrb[12].mxu1 }
 0x1ee   : > { %v997_v56 = vpop.f32.mrb[13].mxu1  ;;  %v1006_v58 = vadd.f32 %v2136_v55, %v2599_v15 }
 0x1ef   : > { %v2137_v57 = vpop.f32.mrb[14].mxu1  ;;  %v998_v61 = vadd.f32 %v2599_v15, %v997_v56 }
 0x1f0   : > { %v1009_v59 = vadd.f32 %v2137_v57, %v2599_v15  ;;  %v1000_v60 = vpop.f32.mrb[15].mxu1 }
 0x1f1   : > { %v1001_v62 = vadd.f32 %v2599_v15, %v1000_v60 }
 0x1f2   : > { %v1817_v63 = vpack.c.bf16 %v1009_v59, %v1006_v58 }
 0x1f3   : > { %v1812_v0 = vpack.c.bf16 %v1001_v62, %v998_v61 }
 0x1f4   : > { %1937 = vst [vmem:[%s2607_s26 + $0x48] sm:$0xff] %v1817_v63  }
 0x1f5   : > { %1936 = vst [vmem:[%s2607_s26 + $0x40] sm:$0xff] %v1812_v0   ;;  %v2140_v1 = vpop.f32.mrb[16].mxu1 }
 0x1f6   : > { %v1013_v2 = vpop.f32.mrb[17].mxu1  ;;  %v1022_v4 = vadd.f32 %v2140_v1, %v2599_v15 }
 0x1f7   : > { %v2141_v3 = vpop.f32.mrb[18].mxu1  ;;  %v1014_v7 = vadd.f32 %v2599_v15, %v1013_v2 }
 0x1f8   : > { %v1025_v5 = vadd.f32 %v2141_v3, %v2599_v15  ;;  %v1016_v6 = vpop.f32.mrb[19].mxu1 }
 0x1f9   : > { %v1017_v8 = vadd.f32 %v2599_v15, %v1016_v6 }
 0x1fa   : > { %v1827_v9 = vpack.c.bf16 %v1025_v5, %v1022_v4 }
 0x1fb   : > { %v1822_v10 = vpack.c.bf16 %v1017_v8, %v1014_v7 }
 0x1fc   : > { %1939 = vst [vmem:[%s2607_s26 + $0x58] sm:$0xff] %v1827_v9  }
 0x1fd   : > { %1938 = vst [vmem:[%s2607_s26 + $0x50] sm:$0xff] %v1822_v10   ;;  %v2144_v11 = vpop.f32.mrb[20].mxu1 }
 0x1fe   : > { %v1029_v12 = vpop.f32.mrb[21].mxu1  ;;  %v1038_v14 = vadd.f32 %v2144_v11, %v2599_v15 }
 0x1ff   : > { %v2145_v13 = vpop.f32.mrb[22].mxu1  ;;  %v1030_v42 = vadd.f32 %v2599_v15, %v1029_v12 }
 0x200   : > { %v1041_v16 = vadd.f32 %v2145_v13, %v2599_v15  ;;  %v1032_v17 = vpop.f32.mrb[23].mxu1 }
 0x201   : > { %v1033_v18 = vadd.f32 %v2599_v15, %v1032_v17 }
 0x202   : > { %v1837_v19 = vpack.c.bf16 %v1041_v16, %v1038_v14 }
 0x203   : > { %v1832_v20 = vpack.c.bf16 %v1033_v18, %v1030_v42 }
 0x204   : > { %1941 = vst [vmem:[%s2607_s26 + $0x68] sm:$0xff] %v1837_v19  }
 0x205   : > { %1940 = vst [vmem:[%s2607_s26 + $0x60] sm:$0xff] %v1832_v20   ;;  %v2148_v21 = vpop.f32.mrb[24].mxu1 }
 0x206   : > { %v1045_v22 = vpop.f32.mrb[25].mxu1  ;;  %v1054_v24 = vadd.f32 %v2148_v21, %v2599_v15 }
 0x207   : > { %v2149_v23 = vpop.f32.mrb[26].mxu1  ;;  %v1046_v27 = vadd.f32 %v2599_v15, %v1045_v22 }
 0x208   : > { %v1057_v25 = vadd.f32 %v2149_v23, %v2599_v15  ;;  %v1048_v26 = vpop.f32.mrb[27].mxu1 }
 0x209   : > { %v1049_v28 = vadd.f32 %v2599_v15, %v1048_v26 }
 0x20a   : > { %v1847_v29 = vpack.c.bf16 %v1057_v25, %v1054_v24 }
 0x20b   : > { %v1842_v30 = vpack.c.bf16 %v1049_v28, %v1046_v27 }
 0x20c   : > { %1943 = vst [vmem:[%s2607_s26 + $0x78] sm:$0xff] %v1847_v29  }
 0x20d   : > { %1942 = vst [vmem:[%s2607_s26 + $0x70] sm:$0xff] %v1842_v30   ;;  %v2152_v31 = vpop.f32.mrb[28].mxu1 }
 0x20e   : > { %v1061_v32 = vpop.f32.mrb[29].mxu1  ;;  %v1070_v34 = vadd.f32 %v2152_v31, %v2599_v15 }
 0x20f   : > { %v2153_v33 = vpop.f32.mrb[30].mxu1  ;;  %v1062_v37 = vadd.f32 %v2599_v15, %v1061_v32 }
 0x210   : > { %v1073_v35 = vadd.f32 %v2153_v33, %v2599_v15  ;;  %v1064_v36 = vpop.f32.mrb[31].mxu1 }
 0x211   : > { %v1065_v38 = vadd.f32 %v2599_v15, %v1064_v36 }
 0x212   : > { %v1857_v39 = vpack.c.bf16 %v1073_v35, %v1070_v34 }
 0x213   : > { %v1852_v40 = vpack.c.bf16 %v1065_v38, %v1062_v37 }
 0x214   : > { %1945 = vst [vmem:[%s2607_s26 + $0x88] sm:$0xff] %v1857_v39  }
 0x215   : > { %1944 = vst [vmem:[%s2607_s26 + $0x80] sm:$0xff] %v1852_v40   ;;  %v2156_v41 = vpop.f32.mrb[32].mxu1 }
 0x216   : > { %v1077_v43 = vpop.f32.mrb[33].mxu1  ;;  %v1086_v45 = vadd.f32 %v2156_v41, %v2599_v15 }
 0x217   : > { %v2157_v44 = vpop.f32.mrb[34].mxu1  ;;  %v1078_v48 = vadd.f32 %v2599_v15, %v1077_v43 }
 0x218   : > { %v1089_v46 = vadd.f32 %v2157_v44, %v2599_v15  ;;  %v1080_v47 = vpop.f32.mrb[35].mxu1 }
 0x219   : > { %v1081_v49 = vadd.f32 %v2599_v15, %v1080_v47 }
 0x21a   : > { %v1867_v50 = vpack.c.bf16 %v1089_v46, %v1086_v45 }
 0x21b   : > { %v1862_v51 = vpack.c.bf16 %v1081_v49, %v1078_v48 }
 0x21c   : > { %1947 = vst [vmem:[%s2607_s26 + $0x98] sm:$0xff] %v1867_v50  }
 0x21d   : > { %1946 = vst [vmem:[%s2607_s26 + $0x90] sm:$0xff] %v1862_v51   ;;  %v2160_v52 = vpop.f32.mrb[36].mxu1 }
 0x21e   : > { %v1093_v53 = vpop.f32.mrb[37].mxu1  ;;  %v1102_v55 = vadd.f32 %v2160_v52, %v2599_v15 }
 0x21f   : > { %v2161_v54 = vpop.f32.mrb[38].mxu1  ;;  %v1094_v58 = vadd.f32 %v2599_v15, %v1093_v53 }
 0x220   : > { %v1105_v56 = vadd.f32 %v2161_v54, %v2599_v15  ;;  %v1096_v57 = vpop.f32.mrb[39].mxu1 }
 0x221   : > { %v1097_v59 = vadd.f32 %v2599_v15, %v1096_v57 }
 0x222   : > { %v1877_v60 = vpack.c.bf16 %v1105_v56, %v1102_v55 }
 0x223   : > { %v1872_v61 = vpack.c.bf16 %v1097_v59, %v1094_v58 }
 0x224   : > { %1949 = vst [vmem:[%s2607_s26 + $0xa8] sm:$0xff] %v1877_v60  }
 0x225   : > { %1948 = vst [vmem:[%s2607_s26 + $0xa0] sm:$0xff] %v1872_v61   ;;  %v2164_v62 = vpop.f32.mrb[40].mxu1 }
 0x226   : > { %v1109_v63 = vpop.f32.mrb[41].mxu1  ;;  %v1118_v1 = vadd.f32 %v2164_v62, %v2599_v15 }
 0x227   : > { %v2165_v0 = vpop.f32.mrb[42].mxu1  ;;  %v1110_v4 = vadd.f32 %v2599_v15, %v1109_v63 }
 0x228   : > { %v1121_v2 = vadd.f32 %v2165_v0, %v2599_v15  ;;  %v1112_v3 = vpop.f32.mrb[43].mxu1 }
 0x229   : > { %v1113_v5 = vadd.f32 %v2599_v15, %v1112_v3 }
 0x22a   : > { %v1887_v6 = vpack.c.bf16 %v1121_v2, %v1118_v1 }
 0x22b   : > { %v1882_v7 = vpack.c.bf16 %v1113_v5, %v1110_v4 }
 0x22c   : > { %1951 = vst [vmem:[%s2607_s26 + $0xb8] sm:$0xff] %v1887_v6  }
 0x22d   : > { %1950 = vst [vmem:[%s2607_s26 + $0xb0] sm:$0xff] %v1882_v7   ;;  %v2168_v8 = vpop.f32.mrb[44].mxu1 }
 0x22e   : > { %v1125_v9 = vpop.f32.mrb[45].mxu1  ;;  %v1134_v11 = vadd.f32 %v2168_v8, %v2599_v15 }
 0x22f   : > { %v2169_v10 = vpop.f32.mrb[46].mxu1  ;;  %v1126_v14 = vadd.f32 %v2599_v15, %v1125_v9 }
 0x230   : > { %v1137_v12 = vadd.f32 %v2169_v10, %v2599_v15  ;;  %v1128_v13 = vpop.f32.mrb[47].mxu1 }
 0x231   : > { %v1129_v16 = vadd.f32 %v2599_v15, %v1128_v13 }
 0x232   : > { %v1897_v17 = vpack.c.bf16 %v1137_v12, %v1134_v11 }
 0x233   : > { %v1892_v42 = vpack.c.bf16 %v1129_v16, %v1126_v14 }
 0x234   : > { %1953 = vst [vmem:[%s2607_s26 + $0xc8] sm:$0xff] %v1897_v17  }
 0x235   : > { %1952 = vst [vmem:[%s2607_s26 + $0xc0] sm:$0xff] %v1892_v42   ;;  %v2172_v18 = vpop.f32.mrb[48].mxu1 }
 0x236   : > { %v1141_v19 = vpop.f32.mrb[49].mxu1  ;;  %v1150_v21 = vadd.f32 %v2172_v18, %v2599_v15 }
 0x237   : > { %v2173_v20 = vpop.f32.mrb[50].mxu1  ;;  %v1142_v24 = vadd.f32 %v2599_v15, %v1141_v19 }
 0x238   : > { %v1153_v22 = vadd.f32 %v2173_v20, %v2599_v15  ;;  %v1144_v23 = vpop.f32.mrb[51].mxu1 }
 0x239   : > { %v1145_v25 = vadd.f32 %v2599_v15, %v1144_v23 }
 0x23a   : > { %v1907_v26 = vpack.c.bf16 %v1153_v22, %v1150_v21 }
 0x23b   : > { %v1902_v27 = vpack.c.bf16 %v1145_v25, %v1142_v24 }
 0x23c   : > { %1955 = vst [vmem:[%s2607_s26 + $0xd8] sm:$0xff] %v1907_v26  }
 0x23d   : > { %1954 = vst [vmem:[%s2607_s26 + $0xd0] sm:$0xff] %v1902_v27   ;;  %v2176_v28 = vpop.f32.mrb[52].mxu1 }
 0x23e   : > { %v1157_v29 = vpop.f32.mrb[53].mxu1  ;;  %v1166_v31 = vadd.f32 %v2176_v28, %v2599_v15 }
 0x23f   : > { %v2177_v30 = vpop.f32.mrb[54].mxu1  ;;  %v1158_v34 = vadd.f32 %v2599_v15, %v1157_v29 }
 0x240   : > { %v1169_v32 = vadd.f32 %v2177_v30, %v2599_v15  ;;  %v1160_v33 = vpop.f32.mrb[55].mxu1 }
 0x241   : > { %v1161_v35 = vadd.f32 %v2599_v15, %v1160_v33 }
 0x242   : > { %v1917_v36 = vpack.c.bf16 %v1169_v32, %v1166_v31 }
 0x243   : > { %v1912_v37 = vpack.c.bf16 %v1161_v35, %v1158_v34 }
 0x244   : > { %1957 = vst [vmem:[%s2607_s26 + $0xe8] sm:$0xff] %v1917_v36  }
 0x245   : > { %1956 = vst [vmem:[%s2607_s26 + $0xe0] sm:$0xff] %v1912_v37   ;;  %v2180_v38 = vpop.f32.mrb[56].mxu1 }
 0x246   : > { %v1173_v39 = vpop.f32.mrb[57].mxu1  ;;  %v1182_v41 = vadd.f32 %v2180_v38, %v2599_v15 }
 0x247   : > { %v2181_v40 = vpop.f32.mrb[58].mxu1  ;;  %v1174_v45 = vadd.f32 %v2599_v15, %v1173_v39 }
 0x248   : > { %v1185_v43 = vadd.f32 %v2181_v40, %v2599_v15  ;;  %v1176_v44 = vpop.f32.mrb[59].mxu1 }
 0x249   : > { %v1177_v46 = vadd.f32 %v2599_v15, %v1176_v44 }
 0x24a   : > { %v1927_v47 = vpack.c.bf16 %v1185_v43, %v1182_v41 }
 0x24b   : > { %v1922_v48 = vpack.c.bf16 %v1177_v46, %v1174_v45 }
 0x24c   : > { %1959 = vst [vmem:[%s2607_s26 + $0xf8] sm:$0xff] %v1927_v47  }
 0x24d   : > { %1958 = vst [vmem:[%s2607_s26 + $0xf0] sm:$0xff] %v1922_v48  }
 0x24e   : > { %2262 = shalt.err (!%p2259_p3)
}
 0x24f   : > { %s2263_s14 = scalar_lea.hbm %s2704_s9, 4096  ;;  %s2267_s17 = scalar_lea.hbm %s2758_s5, 8192 }
 0x250   : > { %p2264_p4 = scmp.ne.s32.totalorder %s2704_s9, %s2263_s14  ;;  %p2268_p9 = scmp.lt.u32.totalorder %s2704_s9, %s2758_s5 }
 0x251   : > { %p2269_p10 = scmp.lt.u32.totalorder %s2267_s17, %s2263_s14  ;;  %p2271_p12 = scmp.lt.u32.totalorder %s2263_s14, %s2704_s9 }
 0x252   : > { %p2265_p7 = pnand %p2264_p4, %p2384_p5 }
 0x253   : > { %p2270_p11 = por %p2269_p10, %p2268_p9 }
 0x254   : > { %p2266_p8 = pneg %p2265_p7 }
 0x255   : > { %p2272_p13 = por %p2271_p12, %p2270_p11 }
 0x257   : > { %p2273_p0 = pnand %p2272_p13, %p2266_p8 }
 0x259   : > { %2276 = shalt.err (!%p2273_p0)
}
 0x25a   : > { %s2314_s26 = smov 64   ;;  %s2315_s30 = smov 4  }
 0x25b   : > { %2198 = dma.vmem_to_hbm [thread:$0]  (%p2384_p5), %s2706_s6, 4096, %s2704_s9, %s2712_s22, %s2314_s26, %s2314_s26, %s2315_s30  }
 0x25c PF: > { %p2204_p1 = scmp.ge.s32.totalorder %s2311_s21, 2  ;;  %s1537_s7 = sand.u32 1, %s2299_s18  }
 0x25d   : > { %s1538_s8 = scalar_lea.sflag [#allocation3], %s1537_s7 }
 0x25e   : > { %p2201_p2 = pnand %p2204_p1, %p2388_p6 }
 0x260   : > { %2294 = dma.done.wait (!%p2201_p2), %s1538_s8, 4096  }
 0x261   : > { %2296 = vsyncadd (!%p2201_p2), %s1538_s8, 4294963200  ;;  %p15_p3 = scmp.ge.s32.totalorder %s2371_s24, 4   ;;  %s2761_s18 = smov %s2303_s19 }
 0x262   : > { %s2762_s19 = smov %s2307_s20  ;;  %s2763_s20 = smov %s2382_s27 }
 0x263   : > { %s2764_s21 = smov %s2371_s24  ;;  %17 = sbr.rel (!%p15_p3) target bundleno = 3 (0x3), region = 75 }
 0x26a   :  { %1543 = vsyncpa [#allocation3], 1 }
 0x26b   :  { %1545 = vsyncpa [#allocation3 + $0x1], 1 }

</bundles_post_ra>
